<compile_context>
chip_gen: v7x
topology: tpu7x:2x2x1
jax: 0.10.0
libtpu: 0.0.40
codegen_flags: <defaults>
</compile_context>

<pallas_src>
import functools
import math

import jax
import jax.numpy as jnp
from jax.experimental import pallas as pl
from jax.experimental.pallas import tpu as pltpu


# --------------------------- chip-aware constants ---------------------------

def _chip_tile_limits():
    kind = ""
    try:
        kind = jax.devices()[0].device_kind.lower()
    except Exception:
        pass
    if "v5 lite" in kind or "v5e" in kind or "v5lite" in kind:
        # v5e: 128-wide MXU, small default scoped VMEM -> narrower tiles.
        return 256, 1024
    return 512, 2048


def _vmem_limit_bytes():
    try:
        cap = pltpu.get_tpu_info().vmem_capacity_bytes
    except Exception:
        cap = 64 * 1024 * 1024            # assume smallest (v7x per-core VMEM)
    return int(min(cap * 3 // 4, 100 * 1024 * 1024))


_MAX_TN, _MAX_TK = _chip_tile_limits()
_VMEM_LIMIT = _vmem_limit_bytes()
_M_TILE = 256
_STEP_COST_ROWS = 350                     # ~0.35us per grid step vs K-row stream


# ------------------------------ tiling helpers ------------------------------

def _round_up(x, m):
    return (x + m - 1) // m * m


def _choose_k_tile(K):
    """Pick tk (<= chip max); pad Kp up to a multiple of tk (fewer K steps)."""
    Kp0 = _round_up(max(K, 1), 128)
    if Kp0 <= _MAX_TK:
        return Kp0, Kp0                   # single K step
    best = None
    for tk in (2048, 1024, 512, 256, 128):
        if tk > _MAX_TK:
            continue
        steps = -(-Kp0 // tk)
        cost = steps * (_STEP_COST_ROWS + tk)
        if best is None or cost < best[0]:
            best = (cost, tk, steps)
    _, tk, steps = best
    return steps * tk, tk


def _choose_n_tile(N):
    """Pad N to a multiple of 128; ensure >=2 parallel N steps when Np>=256."""
    Np = _round_up(max(N, 1), 128)
    if Np <= 128:
        return Np, Np
    for tn in (512, 256, 128):
        if tn <= _MAX_TN and Np % tn == 0 and Np // tn >= 2:
            return Np, tn
    return Np, 128


def _pick_m_tile(M):
    Mp = _round_up(max(M, 16), 16)        # bf16 sublane packing
    if Mp <= _M_TILE:
        return Mp, Mp
    Mp = _round_up(Mp, _M_TILE)
    return Mp, _M_TILE


# ------------------------------ Pallas kernels ------------------------------

def _mm_kernel(a_ref, b_ref, bias_ref, o_ref, *acc, apply_relu):
    """Matmul + bias (+ReLU). grid = (m, n, k); no scratch when single K step."""
    if not acc:
        y = jnp.dot(a_ref[...], b_ref[...],
                    preferred_element_type=jnp.float32) + bias_ref[...]
        if apply_relu:
            y = jnp.maximum(y, 0.0)
        o_ref[...] = y.astype(o_ref.dtype)
        return

    (acc_ref,) = acc
    k = pl.program_id(2)

    @pl.when(k == 0)
    def _():
        acc_ref[...] = jnp.zeros_like(acc_ref)

    acc_ref[...] += jnp.dot(a_ref[...], b_ref[...],
                            preferred_element_type=jnp.float32)

    @pl.when(k == pl.num_programs(2) - 1)
    def _():
        y = acc_ref[...] + bias_ref[...]
        if apply_relu:
            y = jnp.maximum(y, 0.0)
        o_ref[...] = y.astype(o_ref.dtype)


def _bn_epilogue(acc, bias_ref, gamma_ref, beta_ref, temb_ref, o_ref,
                 m_true, hw, nbatch, eps):
    """bias -> ReLU -> whole-M BatchNorm -> per-batch temb add -> store."""
    y = jnp.maximum(acc + bias_ref[...], 0.0)                       # ReLU first
    rows = jax.lax.broadcasted_iota(jnp.int32, y.shape, 0)
    ym = jnp.where(rows < m_true, y, 0.0)                           # drop pad rows
    cnt = jnp.float32(m_true)
    mean = jnp.sum(ym, axis=0, keepdims=True) / cnt
    var = jnp.maximum(jnp.sum(ym * ym, axis=0, keepdims=True) / cnt
                      - mean * mean, 0.0)                           # biased var
    yhat = (y - mean) * jax.lax.rsqrt(var + eps) * gamma_ref[...] + beta_ref[...]
    # Fused time-embedding add: h = bn(relu(conv(x))) + temb[batch].
    row_col = jax.lax.broadcasted_iota(jnp.int32, (y.shape[0], 1), 0)
    add = jnp.zeros_like(yhat)
    for b in range(nbatch):
        in_b = jnp.logical_and(row_col >= b * hw,
                               row_col < (b + 1) * hw).astype(jnp.float32)
        add = add + in_b * temb_ref[b:b + 1, :]
    o_ref[...] = (yhat + add).astype(o_ref.dtype)


def _mm_bn_fused_kernel(a_ref, b_ref, bias_ref, gamma_ref, beta_ref, temb_ref,
                        o_ref, *acc, m_true, hw, nbatch, eps):
    """Single-M-tile path: conv-as-matmul + fully fused BN epilogue.
    grid = (n, k)."""
    if not acc:
        y0 = jnp.dot(a_ref[...], b_ref[...], preferred_element_type=jnp.float32)
        _bn_epilogue(y0, bias_ref, gamma_ref, beta_ref, temb_ref, o_ref,
                     m_true, hw, nbatch, eps)
        return

    (acc_ref,) = acc
    k = pl.program_id(1)

    @pl.when(k == 0)
    def _():
        acc_ref[...] = jnp.zeros_like(acc_ref)

    acc_ref[...] += jnp.dot(a_ref[...], b_ref[...],
                            preferred_element_type=jnp.float32)

    @pl.when(k == pl.num_programs(1) - 1)
    def _():
        _bn_epilogue(acc_ref[...], bias_ref, gamma_ref, beta_ref, temb_ref,
                     o_ref, m_true, hw, nbatch, eps)


def _mm_relu_stats_kernel(a_ref, b_ref, bias_ref, z_ref, stats_ref, *scratch,
                          m_true, m_tile):
    """Tiled-M pass 1: z = ReLU(A@W + bias) per (m, n) tile + per-column
    partial sums / sum-of-squares accumulated across M tiles.
    grid = (n, m, k) with ("parallel", "arbitrary", "arbitrary")."""
    if len(scratch) == 2:
        acc_ref, st_ref = scratch
    else:
        acc_ref = None
        (st_ref,) = scratch
    m = pl.program_id(1)
    k = pl.program_id(2)
    nm = pl.num_programs(1)
    nk = pl.num_programs(2)

    @pl.when(jnp.logical_and(m == 0, k == 0))
    def _():
        st_ref[...] = jnp.zeros_like(st_ref)

    if acc_ref is not None:
        @pl.when(k == 0)
        def _():
            acc_ref[...] = jnp.zeros_like(acc_ref)

        acc_ref[...] += jnp.dot(a_ref[...], b_ref[...],
                                preferred_element_type=jnp.float32)

    @pl.when(k == nk - 1)
    def _():
        if acc_ref is not None:
            y = acc_ref[...] + bias_ref[...]
        else:
            y = jnp.dot(a_ref[...], b_ref[...],
                        preferred_element_type=jnp.float32) + bias_ref[...]
        y = jnp.maximum(y, 0.0)                                     # ReLU before BN
        z_ref[...] = y.astype(z_ref.dtype)
        rows = jax.lax.broadcasted_iota(jnp.int32, y.shape, 0) + m * m_tile
        ym = jnp.where(rows < m_true, y, 0.0)                       # drop pad rows
        st_ref[0:1, :] = st_ref[0:1, :] + jnp.sum(ym, axis=0, keepdims=True)
        st_ref[1:2, :] = st_ref[1:2, :] + jnp.sum(ym * ym, axis=0, keepdims=True)

    @pl.when(jnp.logical_and(m == nm - 1, k == nk - 1))
    def _():
        stats_ref[...] = st_ref[...]


def _bn_finalize_kernel(z_ref, stats_ref, gamma_ref, beta_ref, temb_ref, o_ref,
                        *, m_true, m_tile, hw, nbatch, eps):
    """Tiled-M pass 2: normalize with whole-M stats, gamma/beta, + temb add.
    grid = (m, n)."""
    cnt = jnp.float32(m_true)
    mean = stats_ref[0:1, :] / cnt
    var = jnp.maximum(stats_ref[1:2, :] / cnt - mean * mean, 0.0)
    inv = jax.lax.rsqrt(var + eps) * gamma_ref[...]
    y = (z_ref[...].astype(jnp.float32) - mean) * inv + beta_ref[...]
    rows = (jax.lax.broadcasted_iota(jnp.int32, (z_ref.shape[0], 1), 0)
            + pl.program_id(0) * m_tile)
    add = jnp.zeros_like(y)
    for b in range(nbatch):
        in_b = jnp.logical_and(rows >= b * hw,
                               rows < (b + 1) * hw).astype(jnp.float32)
        add = add + in_b * temb_ref[b:b + 1, :]
    o_ref[...] = (y + add).astype(o_ref.dtype)


# ------------------------------ matmul wrappers ------------------------------

def _pad_a(a, M, K, Mp, Kp):
    a_p = a.astype(jnp.bfloat16)
    if (Mp, Kp) != (M, K):
        a_p = jnp.pad(a_p, ((0, Mp - M), (0, Kp - K)))
    return a_p


def pallas_matmul(a, prep, *, relu=False, out_dtype=jnp.bfloat16):
    """(M,K) @ prepared (Kp,Np) bf16 weight + bias (+ReLU); M, N, K all tiled."""
    M, K = a.shape
    Kp, tk, Np, tn, N = prep['Kp'], prep['tk'], prep['Np'], prep['tn'], prep['N']
    Mp, tm = _pick_m_tile(M)
    a_p = _pad_a(a, M, K, Mp, Kp)
    nm, nn, nk = Mp // tm, Np // tn, Kp // tk

    scratch = [] if nk == 1 else [pltpu.VMEM((tm, tn), jnp.float32)]
    out = pl.pallas_call(
        functools.partial(_mm_kernel, apply_relu=relu),
        out_shape=jax.ShapeDtypeStruct((Mp, Np), out_dtype),
        grid=(nm, nn, nk),
        in_specs=[pl.BlockSpec((tm, tk), lambda i, j, k: (i, k)),
                  pl.BlockSpec((tk, tn), lambda i, j, k: (k, j)),
                  pl.BlockSpec((1, tn), lambda i, j, k: (0, j))],
        out_specs=pl.BlockSpec((tm, tn), lambda i, j, k: (i, j)),
        scratch_shapes=scratch,
        compiler_params=pltpu.CompilerParams(
            dimension_semantics=("parallel", "parallel", "arbitrary"),
            vmem_limit_bytes=_VMEM_LIMIT),
    )(a_p, prep['w'], prep['b'])
    return out[:M, :N]


def pallas_conv_bn(patches, prep, temb, hw, nbatch, eps=1e-5):
    """conv-as-matmul + bias + ReLU + training-mode BatchNorm (+fused temb add).

    nm == 1  -> single fused kernel (whole-M stats in the epilogue).
    nm  > 1  -> pass 1 (matmul + partial column sums across M tiles) then
                pass 2 (BN finalize) so the batch statistics stay exact.
    """
    M, K = patches.shape
    Kp, tk, Np, tn, N = prep['Kp'], prep['tk'], prep['Np'], prep['tn'], prep['N']
    Mp, tm = _pick_m_tile(M)
    a_p = _pad_a(patches, M, K, Mp, Kp)
    nm, nn, nk = Mp // tm, Np // tn, Kp // tk

    if temb is None:
        temb_p = jnp.zeros((nbatch, Np), jnp.float32)
    else:
        temb_p = jnp.zeros((nbatch, Np), jnp.float32).at[:, :N].set(
            temb.astype(jnp.float32))

    if nm == 1:
        scratch = [] if nk == 1 else [pltpu.VMEM((Mp, tn), jnp.float32)]
        out = pl.pallas_call(
            functools.partial(_mm_bn_fused_kernel, m_true=M, hw=hw,
                              nbatch=nbatch, eps=eps),
            out_shape=jax.ShapeDtypeStruct((Mp, Np), jnp.bfloat16),
            grid=(nn, nk),
            in_specs=[pl.BlockSpec((Mp, tk), lambda j, k: (0, k)),
                      pl.BlockSpec((tk, tn), lambda j, k: (k, j)),
                      pl.BlockSpec((1, tn), lambda j, k: (0, j)),
                      pl.BlockSpec((1, tn), lambda j, k: (0, j)),
                      pl.BlockSpec((1, tn), lambda j, k: (0, j)),
                      pl.BlockSpec((nbatch, tn), lambda j, k: (0, j))],
            out_specs=pl.BlockSpec((Mp, tn), lambda j, k: (0, j)),
            scratch_shapes=scratch,
            compiler_params=pltpu.CompilerParams(
                dimension_semantics=("parallel", "arbitrary"),
                vmem_limit_bytes=_VMEM_LIMIT),
        )(a_p, prep['w'], prep['b'], prep['g'], prep['bt'], temb_p)
        return out[:M, :N]

    # ---- pass 1: tiled-M matmul + ReLU + partial BN statistics ----
    scratch = []
    if nk > 1:
        scratch.append(pltpu.VMEM((tm, tn), jnp.float32))
    scratch.append(pltpu.VMEM((2, tn), jnp.float32))
    z, stats = pl.pallas_call(
        functools.partial(_mm_relu_stats_kernel, m_true=M, m_tile=tm),
        out_shape=(jax.ShapeDtypeStruct((Mp, Np), jnp.bfloat16),
                   jax.ShapeDtypeStruct((2, Np), jnp.float32)),
        grid=(nn, nm, nk),
        in_specs=[pl.BlockSpec((tm, tk), lambda n, m, k: (m, k)),
                  pl.BlockSpec((tk, tn), lambda n, m, k: (k, n)),
                  pl.BlockSpec((1, tn), lambda n, m, k: (0, n))],
        out_specs=(pl.BlockSpec((tm, tn), lambda n, m, k: (m, n)),
                   pl.BlockSpec((2, tn), lambda n, m, k: (0, n))),
        scratch_shapes=scratch,
        compiler_params=pltpu.CompilerParams(
            dimension_semantics=("parallel", "arbitrary", "arbitrary"),
            vmem_limit_bytes=_VMEM_LIMIT),
    )(a_p, prep['w'], prep['b'])

    # ---- pass 2: BN finalize (+ temb add) ----
    h = pl.pallas_call(
        functools.partial(_bn_finalize_kernel, m_true=M, m_tile=tm, hw=hw,
                          nbatch=nbatch, eps=eps),
        out_shape=jax.ShapeDtypeStruct((Mp, Np), jnp.bfloat16),
        grid=(nm, nn),
        in_specs=[pl.BlockSpec((tm, tn), lambda i, j: (i, j)),
                  pl.BlockSpec((2, tn), lambda i, j: (0, j)),
                  pl.BlockSpec((1, tn), lambda i, j: (0, j)),
                  pl.BlockSpec((1, tn), lambda i, j: (0, j)),
                  pl.BlockSpec((nbatch, tn), lambda i, j: (0, j))],
        out_specs=pl.BlockSpec((tm, tn), lambda i, j: (i, j)),
        compiler_params=pltpu.CompilerParams(
            dimension_semantics=("parallel", "parallel"),
            vmem_limit_bytes=_VMEM_LIMIT),
    )(z, stats, prep['g'], prep['bt'], temb_p)
    return h[:M, :N]


# ------------------------------- conv wrappers -------------------------------

def _im2col(x, kh, kw, stride, pad):
    """NHWC im2col (bf16 XLA glue)."""
    # TODO(synk): fuse im2col into the matmul via a kh*kw tap grid axis with
    # shifted-slab BlockSpecs to avoid the kh*kw-times larger HBM copy of x.
    B, H, W, Cin = x.shape
    if pad:
        x = jnp.pad(x, ((0, 0), (pad, pad), (pad, pad), (0, 0)))
    Ho = (H + 2 * pad - kh) // stride + 1
    Wo = (W + 2 * pad - kw) // stride + 1
    cols = []
    for ki in range(kh):
        for kj in range(kw):
            cols.append(x[:, ki:ki + (Ho - 1) * stride + 1:stride,
                           kj:kj + (Wo - 1) * stride + 1:stride, :])
    patches = jnp.concatenate(cols, axis=-1).reshape(B * Ho * Wo, kh * kw * Cin)
    return patches, Ho, Wo


def conv2d(x, prep, *, relu=False, out_dtype=jnp.bfloat16):
    B = x.shape[0]
    patches, Ho, Wo = _im2col(x, prep['kh'], prep['kw'], prep['stride'], prep['pad'])
    out = pallas_matmul(patches, prep, relu=relu, out_dtype=out_dtype)
    return out.reshape(B, Ho, Wo, prep['N'])


def conv2d_bn(x, prep, temb=None):
    """Block conv: bnorm(relu(conv(x))) [+ temb broadcast add, fused]."""
    B = x.shape[0]
    patches, Ho, Wo = _im2col(x, prep['kh'], prep['kw'], prep['stride'], prep['pad'])
    out = pallas_conv_bn(patches, prep, temb, hw=Ho * Wo, nbatch=B)
    return out.reshape(B, Ho, Wo, prep['N'])


def conv_transpose2d(x, prep):
    """ConvTranspose2d(k=4, s=2, p=1) via sub-pixel decomposition.

    One 2x2/pad-1/stride-1 im2col GEMM against a (4*Cin, 4*Cout) combined
    weight (one output group per parity (a, b)), then interleave the four
    groups back onto the 2H x 2W grid.  No dilated zeros hit the MXU.
    """
    B, H, W, Cin = x.shape
    Cout = prep['cout']
    patches, Ho, Wo = _im2col(x, 2, 2, 1, 1)            # Ho = H+1, Wo = W+1
    y = pallas_matmul(patches, prep, out_dtype=jnp.bfloat16)
    y = y.reshape(B, Ho, Wo, 4, Cout)
    out = jnp.zeros((B, 2 * H, 2 * W, Cout), y.dtype)
    for a in range(2):
        for b in range(2):
            out = out.at[:, a::2, b::2, :].set(y[:, a:a + H, b:b + W, a * 2 + b, :])
    return out


def attention_block(ap, x):
    """nn.MultiheadAttention(embed_dim=C, num_heads=4, batch_first=True).

    Projections run as Pallas GEMMs; the softmax core runs as plain XLA since
    L = H*W is tiny at the bottleneck (per perf review).
    """
    B, H, W, C = x.shape
    L = H * W
    nh, dh = 4, C // 4
    xf = x.reshape(B * L, C)
    qkv = pallas_matmul(xf, ap['in_proj'], out_dtype=jnp.float32)
    q, k, v = jnp.split(qkv, 3, axis=-1)

    def to_heads(a):
        return a.reshape(B, L, nh, dh).transpose(0, 2, 1, 3)   # (B, nh, L, dh)

    qh, kh_, vh = to_heads(q), to_heads(k), to_heads(v)
    s = jnp.einsum('bhqd,bhkd->bhqk', qh, kh_) / math.sqrt(dh)
    p = jax.nn.softmax(s, axis=-1)
    o = jnp.einsum('bhqk,bhkd->bhqd', p, vh)
    o = o.transpose(0, 2, 1, 3).reshape(B * L, C)
    out = pallas_matmul(o, ap['out_proj'], out_dtype=jnp.bfloat16)
    return out.reshape(B, H, W, C)


# ----------------------------- model definition ------------------------------

DOWN_CH = (64, 128, 256, 512, 1024)
UP_CH = (1024, 512, 256, 128, 64)
TIME_EMB_DIM = 32


def sinusoidal_embedding(t, dim):
    half = dim // 2
    freqs = jnp.exp(jnp.arange(half, dtype=jnp.float32)
                    * -(math.log(10000.0) / (half - 1)))
    args = t.astype(jnp.float32)[:, None] * freqs[None, :]
    return jnp.concatenate([jnp.sin(args), jnp.cos(args)], axis=-1)


def block_forward(bq, x, t_emb):
    # tiny (B, 32) linear: plain XLA dot instead of a Pallas launch
    temb = jnp.maximum(jnp.dot(t_emb, bq['time_w'].T) + bq['time_b'], 0.0)
    h = conv2d_bn(x, bq['conv1'], temb=temb)     # bn1(relu(conv1)) + temb (fused)
    h = conv2d_bn(h, bq['conv2'], temb=None)     # bn2(relu(conv2))
    if bq['up']:
        return conv_transpose2d(h, bq['transform'])
    return conv2d(h, bq['transform'])


def unet_forward(prep, x_nchw, t):
    x = jnp.transpose(x_nchw, (0, 2, 3, 1)).astype(jnp.bfloat16)   # NCHW -> NHWC
    t_emb = sinusoidal_embedding(t, TIME_EMB_DIM)
    t_emb = jnp.maximum(jnp.dot(t_emb, prep['time_lin_w'].T) + prep['time_lin_b'], 0.0)

    x = conv2d(x, prep['input'])

    skips = []
    for bq in prep['enc']:
        x = block_forward(bq, x, t_emb)
        skips.append(x)

    x = attention_block(prep['attn'], x)

    for bq in prep['dec']:
        skip = skips.pop()
        x = jnp.concatenate([x, skip], axis=-1)                    # == dim=1 in NCHW
        x = block_forward(bq, x, t_emb)

    out = conv2d(x, prep['out'], out_dtype=jnp.float32)
    return jnp.transpose(out, (0, 3, 1, 2))                        # NHWC -> NCHW


# ---------------------- parameter init + one-time prep -----------------------

def init_params(key):
    keys = iter(jax.random.split(key, 256))

    def u(shape, fan_in):
        bound = 1.0 / math.sqrt(fan_in)
        return jax.random.uniform(next(keys), shape, jnp.float32, -bound, bound)

    def conv_p(cin, cout, k):
        fan = cin * k * k
        return u((cout, cin, k, k), fan), u((cout,), fan)

    def convT_p(cin, cout, k):
        fan = cout * k * k
        return u((cin, cout, k, k), fan), u((cout,), fan)

    def lin_p(cin, cout):
        return u((cout, cin), cin), u((cout,), cin)

    def block_p(cin, cout, up):
        p = {}
        p['time_w'], p['time_b'] = lin_p(TIME_EMB_DIM, cout)
        p['conv1_w'], p['conv1_b'] = conv_p(cin, cout, 3)
        p['conv2_w'], p['conv2_b'] = conv_p(cout, cout, 3)
        if up:
            p['transform_w'], p['transform_b'] = convT_p(cout, cout, 4)
        else:
            p['transform_w'], p['transform_b'] = conv_p(cout, cout, 4)
        p['bn1_g'] = jnp.ones((cout,), jnp.float32)
        p['bn1_b'] = jnp.zeros((cout,), jnp.float32)
        p['bn2_g'] = jnp.ones((cout,), jnp.float32)
        p['bn2_b'] = jnp.zeros((cout,), jnp.float32)
        return p

    params = {}
    params['time_lin_w'], params['time_lin_b'] = lin_p(TIME_EMB_DIM, TIME_EMB_DIM)
    params['input_w'], params['input_b'] = conv_p(3, DOWN_CH[0], 3)
    params['enc'] = [block_p(DOWN_CH[i], DOWN_CH[i + 1], False) for i in range(4)]
    C = DOWN_CH[-1]
    params['attn'] = {
        'in_proj_w': u((3 * C, C), C),
        'in_proj_b': jnp.zeros((3 * C,), jnp.float32),
        'out_proj_w': u((C, C), C),
        'out_proj_b': jnp.zeros((C,), jnp.float32),
    }
    params['dec'] = [block_p(UP_CH[i] * 2, UP_CH[i + 1], True) for i in range(4)]
    params['out_w'], params['out_b'] = conv_p(UP_CH[-1], 3, 1)
    return params


def _prep_matmul(w_kn, bias, gamma=None, beta=None, *, kh=1, kw=1, stride=1, pad=0):
    """Pre-transpose/pad/cast a weight once: (K,N) -> padded bf16 (Kp,Np)."""
    K, N = w_kn.shape
    Kp, tk = _choose_k_tile(K)
    Np, tn = _choose_n_tile(N)
    w_p = jnp.zeros((Kp, Np), jnp.bfloat16).at[:K, :N].set(w_kn.astype(jnp.bfloat16))
    b_p = jnp.zeros((1, Np), jnp.float32).at[0, :N].set(bias.astype(jnp.float32))
    prep = dict(w=w_p, b=b_p, K=K, N=N, Kp=Kp, Np=Np, tk=tk, tn=tn,
                kh=kh, kw=kw, stride=stride, pad=pad)
    if gamma is not None:
        prep['g'] = jnp.zeros((1, Np), jnp.float32).at[0, :N].set(gamma.astype(jnp.float32))
        prep['bt'] = jnp.zeros((1, Np), jnp.float32).at[0, :N].set(beta.astype(jnp.float32))
    return prep


def _prep_conv(w_oihw, bias, gamma=None, beta=None, *, stride=1, pad=0):
    Cout, Cin, kh, kw = w_oihw.shape
    w_kn = jnp.transpose(w_oihw, (2, 3, 1, 0)).reshape(kh * kw * Cin, Cout)
    return _prep_matmul(w_kn, bias, gamma, beta, kh=kh, kw=kw, stride=stride, pad=pad)


def _prep_conv_transpose(w_iohw, bias):
    """Sub-pixel decomposition of ConvTranspose2d(k=4, s=2, p=1).

    Output parity (a, b) group uses the 2x2 tap subset w[:, :, 3-a-2*kh2,
    3-b-2*kw2] applied to the 2x2 window of x (padded by 1) starting at
    (m + a, n + b); combined weight is (4*Cin, 4*Cout), bias tiled per group.
    """
    Cin, Cout, KH, KW = w_iohw.shape
    wf = jnp.flip(w_iohw, axis=(2, 3))                  # wf[...,p,q] = w[...,3-p,3-q]
    wf = wf.reshape(Cin, Cout, 2, 2, 2, 2)              # (Cin, Cout, kh2, a, kw2, b)
    w_kn = jnp.transpose(wf, (2, 4, 0, 3, 5, 1)).reshape(4 * Cin, 4 * Cout)
    bias_rep = jnp.tile(bias, 4)
    p = _prep_matmul(w_kn, bias_rep)
    p['cout'] = Cout
    return p


def prepare_params(params):
    def prep_block(bp, up):
        q = {'up': up, 'time_w': bp['time_w'], 'time_b': bp['time_b']}
        q['conv1'] = _prep_conv(bp['conv1_w'], bp['conv1_b'],
                                bp['bn1_g'], bp['bn1_b'], stride=1, pad=1)
        q['conv2'] = _prep_conv(bp['conv2_w'], bp['conv2_b'],
                                bp['bn2_g'], bp['bn2_b'], stride=1, pad=1)
        if up:
            q['transform'] = _prep_conv_transpose(bp['transform_w'], bp['transform_b'])
        else:
            q['transform'] = _prep_conv(bp['transform_w'], bp['transform_b'],
                                        stride=2, pad=1)
        return q

    prep = {
        'time_lin_w': params['time_lin_w'], 'time_lin_b': params['time_lin_b'],
        'input': _prep_conv(params['input_w'], params['input_b'], stride=1, pad=1),
        'enc': [prep_block(bp, False) for bp in params['enc']],
        'dec': [prep_block(bp, True) for bp in params['dec']],
        'attn': {
            'in_proj': _prep_matmul(params['attn']['in_proj_w'].T,
                                    params['attn']['in_proj_b']),
            'out_proj': _prep_matmul(params['attn']['out_proj_w'].T,
                                     params['attn']['out_proj_b']),
        },
        'out': _prep_conv(params['out_w'], params['out_b'], stride=1, pad=0),
    }
    return prep


if __name__ == "__main__":
    key = jax.random.PRNGKey(0)
    pkey, xkey, tkey = jax.random.split(key, 3)
    params = init_params(pkey)
    prep = prepare_params(params)          # weight repack/pad/cast: once, not per forward

    # Small but architecture-consistent: 16x16 survives 4 stride-2 downsamples.
    x = jax.random.normal(xkey, (2, 3, 16, 16), jnp.float32)
    t = jax.random.uniform(tkey, (2,), jnp.float32, 0.0, 1000.0)

    out = unet_forward(prep, x, t)
    out = jax.block_until_ready(out)
    assert out.shape == (2, 3, 16, 16), out.shape
    assert bool(jnp.all(jnp.isfinite(out)))
    print("KERNEL_OK")
</pallas_src>

<mosaic_0001>
module attributes {stable_mosaic.version = 11 : i64} {
  func.func @_mm_kernel(%arg0: i32, %arg1: i32, %arg2: i32, %arg3: memref<256x128xbf16, #tpu.memory_space<vmem>>, %arg4: memref<128x128xbf16, #tpu.memory_space<vmem>>, %arg5: memref<1x128xf32, #tpu.memory_space<vmem>>, %arg6: memref<256x128xbf16, #tpu.memory_space<vmem>>) attributes {dimension_semantics = [#tpu.dimension_semantics<parallel>, #tpu.dimension_semantics<parallel>, #tpu.dimension_semantics<arbitrary>], iteration_bounds = array<i64: 2, 1, 1>, scalar_prefetch = 0 : i64, scratch_operands = 0 : i64, tpu.core_type = #tpu.core_type<tc>, window_params = [{transform_indices = @transform_0, window_bounds = array<i64: 256, 128>}, {transform_indices = @transform_1, window_bounds = array<i64: 128, 128>}, {transform_indices = @transform_2, window_bounds = array<i64: 1, 128>}, {transform_indices = @transform_3, window_bounds = array<i64: 256, 128>}]} {
    %c0 = arith.constant 0 : index
    %c0_0 = arith.constant 0 : index
    %0 = vector.load %arg3[%c0, %c0_0] : memref<256x128xbf16, #tpu.memory_space<vmem>>, vector<256x128xbf16>
    %c0_1 = arith.constant 0 : index
    %c0_2 = arith.constant 0 : index
    %1 = vector.load %arg4[%c0_1, %c0_2] : memref<128x128xbf16, #tpu.memory_space<vmem>>, vector<128x128xbf16>
    %cst = arith.constant dense<0.000000e+00> : vector<256x128xf32>
    %2 = tpu.matmul %0, %1, %cst {dimension_numbers = #tpu.dot_dimension_numbers<[1], [0], [0], [1], [0, 0, 1, 1], [], []>} : vector<256x128xbf16>, vector<128x128xbf16>, vector<256x128xf32> -> vector<256x128xf32>
    %c0_3 = arith.constant 0 : index
    %c0_4 = arith.constant 0 : index
    %3 = vector.load %arg5[%c0_3, %c0_4] : memref<1x128xf32, #tpu.memory_space<vmem>>, vector<1x128xf32>
    %4 = vector.broadcast %3 : vector<1x128xf32> to vector<256x128xf32>
    %5 = arith.addf %2, %4 : vector<256x128xf32>
    %6 = arith.truncf %5 : vector<256x128xf32> to vector<256x128xbf16>
    %c0_5 = arith.constant 0 : index
    %c0_6 = arith.constant 0 : index
    %7 = vector.load %arg6[%c0_5, %c0_6] : memref<256x128xbf16, #tpu.memory_space<vmem>>, vector<256x128xbf16>
    tpu.vector_store %arg6[%c0_5, %c0_6], %6 {strides = array<i32>} : memref<256x128xbf16, #tpu.memory_space<vmem>>, vector<256x128xbf16>,
    return
  }
  func.func @transform_0(%arg0: i32, %arg1: i32, %arg2: i32) -> (i32, i32) {
    %c0_i32 = arith.constant 0 : i32
    return %arg0, %arg2 : i32, i32
  }
  func.func @transform_1(%arg0: i32, %arg1: i32, %arg2: i32) -> (i32, i32) {
    %c0_i32 = arith.constant 0 : i32
    return %arg2, %arg1 : i32, i32
  }
  func.func @transform_2(%arg0: i32, %arg1: i32, %arg2: i32) -> (i32, i32) {
    %c0_i32 = arith.constant 0 : i32
    %c0_i32_0 = arith.constant 0 : i32
    return %c0_i32, %arg1 : i32, i32
  }
  func.func @transform_3(%arg0: i32, %arg1: i32, %arg2: i32) -> (i32, i32) {
    %c0_i32 = arith.constant 0 : i32
    return %arg0, %arg1 : i32, i32
  }
}

</mosaic_0001>

<bundles_post_ra>
// kernel: tpu_custom_call.1
= control target key start
LH: loop header
LB: loop body
LE: loop exit
PB: predicated region body
PF: predicated region fallthrough
CT: control target
= control target key end

     0   :  { %8 = vsyncpa [#allocation3], 0  ;;  %s1775_s0 = inlined_call_operand.hbm [shape: bf16[512,128], index: 0, kind: input, shape index: {}]   ;;  %s1776_s1 = inlined_call_operand.hbm [shape: bf16[128,128], index: 1, kind: input, shape index: {}]   ;;  %s1777_s2 = inlined_call_operand.vmem [shape: f32[1,128], index: 2, kind: input, shape index: {}]   ;;  %s1778_s3 = inlined_call_operand.hbm [shape: bf16[512,128], index: 3, kind: output, shape index: {}]  }
   0x1   :  { %10 = vsyncpa [#allocation3 + $0x1], 0 }
   0x2   :  { %11 = vsyncpa [#allocation6], 0 }
   0x3   :  { %12 = vsyncpa [#allocation4], 0 }
   0x4   :  { %14 = vsyncpa [#allocation4 + $0x1], 0  ;;  %s1472_s12 = smov 0   ;;  %s1474_s13 = smov 0  }
   0x5   :  { %s1476_s14 = smov 0   ;;  %s1478_s15 = smov 0  }
   0x6   :  { %s1480_s16 = smov 0   ;;  %s1482_s17 = smov 0  }
   0x7 LB: > { %s906_s18 = sadd.s32 4294967295, %s1443_s17   ;;  %s907_s19 = sadd.s32 4294967294, %s1443_s17   ;;  %s1443_s17 = sphi %s1482_s17, %s20_s17   ;;  %s1439_s16 = sphi %s1480_s16, %s1802_s16   ;;  %s1435_s15 = sphi %s1478_s15, %s1801_s15   ;;  %s1431_s14 = sphi %s1476_s14, %s1800_s14   ;;  %s1427_s13 = sphi %s1474_s13, %s1799_s13   ;;  %s1423_s12 = sphi %s1472_s12, %s1798_s12  }
   0x8   : > { %p61_p0 = scmp.ne.s32.totalorder %s1427_s13, %s1423_s12  ;;  %p1506_p1 = scmp.eq.s32.totalorder %s906_s18, 0 }
   0x9   : > { %p1510_p2 = scmp.eq.s32.totalorder %s906_s18, 1  ;;  %p147_p3 = scmp.eq.s32.totalorder %s907_s19, 1 }
   0xa   : > { %s1783_s20 = scalar_select %p1506_p1, 1, 0 }
   0xb   : > { %s1784_s21 = scalar_select %p1510_p2, 1, 0 }
   0xc   : > { %p1516_p4 = por %p1506_p1, %p61_p0  ;;  %p908_p5 = scmp.ge.s32.totalorder %s1443_s17, 1 }
   0xd   : > { %p1521_p6 = por %p147_p3, %p61_p0  ;;  %p154_p7 = scmp.lt.s32.totalorder %s1443_s17, 3 }
   0xe   : > { %s1785_s22 = scalar_select %p1516_p4, 1, 0 }
   0xf   : > { %s1786_s23 = scalar_select %p1521_p6, 1, 0 }
  0x10   : > { %p1526_p8 = pnand %p908_p5, %p154_p7  ;;  %s1445_s25 = smov [#allocation5]  }
  0x11   : > { %s170_s26 = sshll.u32 %s1445_s25, 4  ;;  %s39_s28 = sadd.s32 1, %s1439_s16  ;;  %s171_s26 = int_to_ptr.vmem [resolvable:$true] %s170_s26 }
  0x12   : > { %s1787_s24 = scalar_select %p1526_p8, 1, 0 }
  0x13   : > { %p1206_p9 = pneg %p1526_p8  ;;  %s1299_s4 = scalar_lea.hbm %s1776_s1, 1024 }
  0x14   : > { %p1300_p12 = scmp.ne.s32.totalorder %s1776_s1, %s1299_s4  ;;  %p1306_p5 = scmp.lt.u32.totalorder %s1299_s4, %s1776_s1 }
  0x15   : > { %p1535_p11 = pnand %p1206_p9, %p1506_p1 }
  0x17   : > { %p1301_p13 = pneg %p1535_p11 }
  0x19   : > { %p1302_p0 = pnand %p1301_p13, %p1300_p12 }
  0x1b   : > { %p1303_p3 = pneg %p1302_p0 }
  0x1d   : > { %p1308_p7 = pnand %p1306_p5, %p1303_p3 }
  0x1f   : > { %1311 = shalt.err (!%p1308_p7)
}
  0x20   : > { %s1312_s9 = scalar_lea.vmem %s171_s26, 1024  ;;  %p1320_p1 = scmp.lt.s32.totalorder %s171_s26, %s171_s26 }
  0x21   : > { %p1313_p9 = scmp.ne.s32.totalorder %s171_s26, %s1312_s9  ;;  %p1321_p4 = scmp.lt.s32.totalorder %s1312_s9, %s1312_s9 }
  0x23   : > { %p1315_p10 = pnand %p1313_p9, %p1301_p13  ;;  %p1322_p8 = por %p1321_p4, %p1320_p1 }
  0x25   : > { %p1316_p6 = pneg %p1315_p10 }
  0x27   : > { %p1323_p2 = pnand %p1322_p8, %p1316_p6 }
  0x29   : > { %1326 = shalt.err (!%p1323_p2)
}
  0x2a   : > { %s1446_s10 = smov 64   ;;  %s1447_s11 = smov 4  }
  0x2b   : > { %1209 = dma.hbm_to_vmem [thread:$0]  (!%p1535_p11), %s1776_s1, 1024, %s171_s26, [#allocation6], %s1446_s10, %s1446_s10, %s1447_s11  }
  0x2c   : > { %p41_p1 = scmp.ge.s32.totalorder %s39_s28, 2  ;;  %s48_s25 = sadd.s32 1, %s1431_s14 }
  0x2d   : > { %p55_p2 = scmp.ne.s32.totalorder %s1431_s14, %s1427_s13  ;;  %p56_p4 = scmp.eq.s32.totalorder %s1443_s17, 0 }
  0x2e   : > { %s1804_s28 = smov (%p41_p1, %s39_s28), 0  ;;  %p1790_p8 = scmp.ne.s32.totalorder %s1784_s21, 0 }
  0x2f   : > { %p1565_p6 = por %p56_p4, %p55_p2  ;;  %s43_s30 = ssub.s32 %s1439_s16, %s1804_s28 }
  0x30   : > { %p1571_p10 = por %p1790_p8, %p55_p2  ;;  %p1219_p12 = scmp.lt.s32.totalorder %s1443_s17, 2 }
  0x31   : > { %p46_p11 = scmp.eq.s32.totalorder %s43_s30, 0  ;;  %s190_s26 = sand.u32 1, %s1431_s14  }
  0x32   : > { %s912_s4 = sshll.u32 %s190_s26, 7  ;;  %s981_s6 = sshll.u32 %s1439_s16, 11 }
  0x33   : > { %s1580_s5 = scalar_select %p46_p11, %s1431_s14, %s48_s25  }
  0x34   : > { %s1586_s9 = scalar_lea.hbm %s1775_s0, %s981_s6  ;;  %s194_s21 = scalar_lea.vmem [#allocation2], %s912_s4 }
  0x35   : > { %s202_s18 = sshll.u32 %s194_s21, 4  ;;  %p1592_p13 = pnand %p1219_p12, %p1565_p6  ;;  %s1588_s18 = int_to_ptr.vmem [resolvable:$true] %s202_s18 }
  0x36   : > { %s1596_s25 = scalar_lea.sflag [#allocation3], %s190_s26  ;;  %s1327_s30 = scalar_lea.hbm %s1586_s9, 2048 }
  0x37   : > { %p1328_p0 = scmp.ne.s32.totalorder %s1586_s9, %s1327_s30  ;;  %p1329_p3 = pneg %p1592_p13 }
  0x38   : > { %s1332_s29 = scalar_lea.hbm %s1775_s0, 4096  ;;  %p1333_p9 = scmp.lt.u32.totalorder %s1586_s9, %s1775_s0 }
  0x39   : > { %p1330_p5 = pnand %p1329_p3, %p1328_p0  ;;  %p1334_p1 = scmp.lt.u32.totalorder %s1332_s29, %s1327_s30 }
  0x3a   : > { %p1336_p4 = scmp.lt.u32.totalorder %s1327_s30, %s1586_s9 }
  0x3b   : > { %p1331_p7 = pneg %p1330_p5  ;;  %p1335_p2 = por %p1334_p1, %p1333_p9 }
  0x3d   : > { %p1337_p6 = por %p1336_p4, %p1335_p2 }
  0x3f   : > { %p1338_p8 = pnand %p1337_p6, %p1331_p7 }
  0x41   : > { %1341 = shalt.err (!%p1338_p8)
}
  0x42   : > { %s1342_s26 = scalar_lea.vmem %s1588_s18, 2048  ;;  %s1448_s21 = smov [#allocation2]  }
  0x43   : > { %p1343_p12 = scmp.ne.s32.totalorder %s1588_s18, %s1342_s26  ;;  %s1347_s4 = sshll.u32 %s1448_s21, 4  ;;  %s1348_s4 = int_to_ptr.vmem [resolvable:$false] %s1347_s4 }
  0x44   : > { %s1349_s6 = scalar_lea.vmem %s1348_s4, 4096  ;;  %p1350_p5 = scmp.lt.s32.totalorder %s1588_s18, %s1348_s4 }
  0x45   : > { %p1345_p11 = pnand %p1343_p12, %p1329_p3  ;;  %p1351_p9 = scmp.lt.s32.totalorder %s1349_s6, %s1342_s26 }
  0x47   : > { %p1346_p0 = pneg %p1345_p11  ;;  %p1352_p1 = por %p1351_p9, %p1350_p5 }
  0x49   : > { %p1353_p2 = pnand %p1352_p1, %p1346_p0 }
  0x4b   : > { %1356 = shalt.err (!%p1353_p2)
}
  0x4c   : > { %1213 = dma.hbm_to_vmem [thread:$0]  (!%p1592_p13), %s1586_s9, 2048, %s1588_s18, %s1596_s25, %s1446_s10, %s1446_s10, %s1447_s11  }
  0x4d   : > { %p1793_p3 = scmp.ne.s32.totalorder %s1787_s24, 0 }
  0x4e   : > { %s1630_s30 = sand.u32 (!%p1793_p3), 1, %s1427_s13   ;;  %p1794_p7 = scmp.ne.s32.totalorder (!%p1793_p3), %s1785_s22, 0 }
  0x4f   : > { %214 = sbr.rel (%p1793_p3) target bundleno = 381 (0x17d), region = 32  ;;  %s916_s29 = sshll.u32 (!%p1793_p3), %s1630_s30, 7 }
  0x50   : > { %s217_s7 = scalar_lea.sflag (!%p1793_p3), [#allocation3], %s1630_s30  ;;  %s1636_s19 = scalar_lea.vmem (!%p1793_p3), [#allocation2], %s916_s29 }
  0x56   : > { %1410 = dma.done.wait (%p1794_p7), %s217_s7, 2048  }
  0x57   : > { %1412 = vsyncadd (%p1794_p7), %s217_s7, 4294965248  ;;  %p1795_p13 = scmp.ne.s32.totalorder %s1783_s20, 0 }
  0x59   : > { %1414 = dma.done.wait (%p1795_p13), [#allocation6], 1024  }
  0x5a   : > { %1416 = vsyncadd (%p1795_p13), [#allocation6], 4294966272  ;;  %v1275_v0 = vld [vmem:[#allocation5] sm:$0xff]   ;;  %v1276_v1 = vld [vmem:[#allocation5 + $0x8] sm:$0xff]   ;;  %s1677_s24 = scalar_lea.vmem [#allocation7], %s916_s29  ;;  %s1014_s10 = sshll.u32 %s1435_s15, 11 }
  0x5b   : > { %1134 = vmatprep.subr.bf16.mxu0 %v1275_v0  ;;  %1182 = vmatprep.subr.bf16.mxu1 %v1275_v0  ;;  %v1277_v2 = vld [vmem:[#allocation5 + $0x10] sm:$0xff]   ;;  %v1278_v3 = vld [vmem:[#allocation5 + $0x18] sm:$0xff]   ;;  %v1283_v4 = vld [vmem:[%s1636_s19] sm:$0xff]   ;;  %s792_s11 = sshll.u32 %s1677_s24, 4  ;;  %s1720_s18 = scalar_lea.hbm %s1778_s3, %s1014_s10  ;;  %s1722_s11 = int_to_ptr.vmem [resolvable:$true] %s792_s11 }
  0x5c   : > { %1135 = vmatpush3.bf16.msra.mxu0 %v1275_v0  ;;  %1190 = vmatpush3.bf16.msra.mxu1 %v1275_v0  ;;  %v1284_v5 = vld [vmem:[%s1636_s19 + $0x40] sm:$0xff]   ;;  %v1280_v7 = vld [vmem:[#allocation5 + $0x28] sm:$0xff]   ;;  %v1281_v8 = vld [vmem:[#allocation5 + $0x30] sm:$0xff]   ;;  %s778_s25 = scalar_lea.sflag [#allocation4], %s1630_s30  ;;  %s1357_s8 = scalar_lea.vmem %s1722_s11, 2048 }
  0x5d   : > { %1136 = vmatprep.subr.bf16.mxu0 %v1276_v1  ;;  %1183 = vmatprep.subr.bf16.mxu1 %v1276_v1  ;;  %v1279_v6 = vld [vmem:[#allocation5 + $0x20] sm:$0xff]   ;;  %v1282_v9 = vld [vmem:[#allocation5 + $0x38] sm:$0xff]   ;;  %v1285_v10 = vld [vmem:[%s1636_s19 + $0x8] sm:$0xff]   ;;  %p1358_p4 = scmp.ne.s32.totalorder %s1722_s11, %s1357_s8  ;;  %s1449_s26 = smov [#allocation7]  }
  0x5e   : > { %1150 = vmatprep.mubr.bf16.mxu0 %v1283_v4  ;;  %1166 = vmatprep.mubr.bf16.mxu1 %v1284_v5  ;;  %v1286_v11 = vld [vmem:[%s1636_s19 + $0x48] sm:$0xff]   ;;  %v1287_v12 = vld [vmem:[%s1636_s19 + $0x10] sm:$0xff]   ;;  %v1289_v14 = vld [vmem:[%s1636_s19 + $0x18] sm:$0xff]   ;;  %s1361_s21 = sshll.u32 %s1449_s26, 4  ;;  %s1362_s21 = int_to_ptr.vmem [resolvable:$false] %s1361_s21 }
  0x5f   : > { %v1288_v13 = vld [vmem:[%s1636_s19 + $0x50] sm:$0xff]   ;;  %v1290_v15 = vld [vmem:[%s1636_s19 + $0x58] sm:$0xff]   ;;  %v1291_v16 = vld [vmem:[%s1636_s19 + $0x20] sm:$0xff]   ;;  %p1359_p6 = pnand %p1358_p4, %p1571_p10  ;;  %s1363_s4 = scalar_lea.vmem %s1362_s21, 4096 }
  0x60   : > { %1137 = vmatpush3.bf16.msra.mxu0 %v1276_v1  ;;  %1191 = vmatpush3.bf16.msra.mxu1 %v1276_v1  ;;  %v1292_v17 = vld [vmem:[%s1636_s19 + $0x60] sm:$0xff]   ;;  %v1293_v18 = vld [vmem:[%s1636_s19 + $0x28] sm:$0xff]   ;;  %v1295_v20 = vld [vmem:[%s1636_s19 + $0x30] sm:$0xff]   ;;  %p1364_p12 = scmp.lt.s32.totalorder %s1722_s11, %s1362_s21  ;;  %p1365_p11 = scmp.lt.s32.totalorder %s1363_s4, %s1357_s8 }
  0x61   : > { %1138 = vmatprep.subr.bf16.mxu0 %v1277_v2  ;;  %1184 = vmatprep.subr.bf16.mxu1 %v1277_v2  ;;  %v1294_v19 = vld [vmem:[%s1636_s19 + $0x68] sm:$0xff]   ;;  %v1296_v21 = vld [vmem:[%s1636_s19 + $0x70] sm:$0xff]   ;;  %v1297_v22 = vld [vmem:[%s1636_s19 + $0x38] sm:$0xff]   ;;  %p1360_p8 = pneg %p1359_p6 }
  0x62   : > { %v1298_v23 = vld [vmem:[%s1636_s19 + $0x78] sm:$0xff]   ;;  %v1665_v25 = vld [vmem:[%s1777_s2] ss:$0 sm:$0xff]  ;;  %p1366_p0 = por %p1365_p11, %p1364_p12 }
  0x64   : > { %1139 = vmatpush3.bf16.msra.mxu0 %v1277_v2  ;;  %1192 = vmatpush3.bf16.msra.mxu1 %v1277_v2  ;;  %p1367_p5 = pnand %p1366_p0, %p1360_p8 }
  0x65   : > { %1140 = vmatprep.subr.bf16.mxu0 %v1278_v3  ;;  %1185 = vmatprep.subr.bf16.mxu1 %v1278_v3 }
  0x68   : > { %1141 = vmatpush3.bf16.msra.mxu0 %v1278_v3  ;;  %1193 = vmatpush3.bf16.msra.mxu1 %v1278_v3 }
  0x69   : > { %1142 = vmatprep.subr.bf16.mxu0 %v1279_v6  ;;  %1186 = vmatprep.subr.bf16.mxu1 %v1279_v6 }
  0x6c   : > { %1143 = vmatpush3.bf16.msra.mxu0 %v1279_v6  ;;  %1194 = vmatpush3.bf16.msra.mxu1 %v1279_v6 }
  0x6d   : > { %1144 = vmatprep.subr.bf16.mxu0 %v1280_v7  ;;  %1187 = vmatprep.subr.bf16.mxu1 %v1280_v7 }
  0x70   : > { %1145 = vmatpush3.bf16.msra.mxu0 %v1280_v7  ;;  %1195 = vmatpush3.bf16.msra.mxu1 %v1280_v7 }
  0x71   : > { %1146 = vmatprep.subr.bf16.mxu0 %v1281_v8  ;;  %1188 = vmatprep.subr.bf16.mxu1 %v1281_v8 }
  0x74   : > { %1147 = vmatpush3.bf16.msra.mxu0 %v1281_v8  ;;  %1196 = vmatpush3.bf16.msra.mxu1 %v1281_v8 }
  0x75   : > { %1148 = vmatprep.subr.bf16.mxu0 %v1282_v9  ;;  %1189 = vmatprep.subr.bf16.mxu1 %v1282_v9 }
  0x78   : > { %1149 = vmatpush3.bf16.msra.mxu0 %v1282_v9  ;;  %1197 = vmatpush3.bf16.msra.mxu1 %v1282_v9 }
  0x7b   : > { %1151 = vmatmul.mubr.bf16.vlgmr.msra.gmra.mrb[0].mxu0 %v1285_v10  ;;  %1167 = vmatmul.mubr.bf16.vlgmr.msra.gmra.mrb[0].mxu1 %v1286_v11 }
  0x7c   : > { %1154 = vmatprep.mubr.bf16.mxu0 %v1287_v12  ;;  %1170 = vmatprep.mubr.bf16.mxu1 %v1288_v13 }
  0x83   : > { %1155 = vmatmul.mubr.bf16.gmra.mrb[4].mxu0 %v1289_v14  ;;  %1171 = vmatmul.mubr.bf16.gmra.mrb[4].mxu1 %v1290_v15 }
  0x84   : > { %1158 = vmatprep.mubr.bf16.mxu0 %v1291_v16  ;;  %1174 = vmatprep.mubr.bf16.mxu1 %v1292_v17 }
  0x8b   : > { %1159 = vmatmul.mubr.bf16.gmra.mrb[8].mxu0 %v1293_v18  ;;  %1175 = vmatmul.mubr.bf16.gmra.mrb[8].mxu1 %v1294_v19 }
  0x8c   : > { %1162 = vmatprep.mubr.bf16.mxu0 %v1295_v20  ;;  %1178 = vmatprep.mubr.bf16.mxu1 %v1296_v21 }
  0x93   : > { %1163 = vmatmul.mubr.bf16.gmra.mrb[12].mxu0 %v1297_v22  ;;  %1179 = vmatmul.mubr.bf16.gmra.mrb[12].mxu1 %v1298_v23 }
 0x14e   : > { %v1152_v24 = vpop.f32.mrb[0].mxu0  ;;  %v1168_v26 = vpop.f32.mrb[0].mxu1 }
 0x14f   : > { %v490_v27 = vpop.f32.mrb[1].mxu0  ;;  %v554_v28 = vpop.f32.mrb[1].mxu1  ;;  %v499_v31 = vadd.f32 %v1152_v24, %v1665_v25  ;;  %v563_v32 = vadd.f32 %v1168_v26, %v1665_v25 }
 0x150   : > { %v1153_v29 = vpop.f32.mrb[2].mxu0  ;;  %v1169_v30 = vpop.f32.mrb[2].mxu1  ;;  %v491_v37 = vadd.f32 %v1665_v25, %v490_v27  ;;  %v555_v38 = vadd.f32 %v1665_v25, %v554_v28 }
 0x151   : > { %v502_v33 = vadd.f32 %v1153_v29, %v1665_v25  ;;  %v566_v34 = vadd.f32 %v1169_v30, %v1665_v25  ;;  %v493_v35 = vpop.f32.mrb[3].mxu0  ;;  %v557_v36 = vpop.f32.mrb[3].mxu1 }
 0x152   : > { %v494_v39 = vadd.f32 %v1665_v25, %v493_v35  ;;  %v558_v40 = vadd.f32 %v1665_v25, %v557_v36 }
 0x153   : > { %v1023_v41 = vpack.c.bf16 %v502_v33, %v499_v31  ;;  %v1063_v42 = vpack.c.bf16 %v566_v34, %v563_v32 }
 0x154   : > { %v1018_v43 = vpack.c.bf16 %v494_v39, %v491_v37  ;;  %v1058_v44 = vpack.c.bf16 %v558_v40, %v555_v38 }
 0x155   : > { %1095 = vst [vmem:[%s1677_s24 + $0x8] sm:$0xff] %v1023_v41   ;;  %1103 = vst [vmem:[%s1677_s24 + $0x48] sm:$0xff] %v1063_v42  }
 0x156   : > { %1019 = vst [vmem:[%s1677_s24] sm:$0xff] %v1018_v43   ;;  %1102 = vst [vmem:[%s1677_s24 + $0x40] sm:$0xff] %v1058_v44   ;;  %v1156_v45 = vpop.f32.mrb[4].mxu0  ;;  %v1172_v46 = vpop.f32.mrb[4].mxu1 }
 0x157   : > { %v506_v47 = vpop.f32.mrb[5].mxu0  ;;  %v570_v48 = vpop.f32.mrb[5].mxu1  ;;  %v515_v51 = vadd.f32 %v1156_v45, %v1665_v25  ;;  %v579_v52 = vadd.f32 %v1172_v46, %v1665_v25 }
 0x158   : > { %v1157_v49 = vpop.f32.mrb[6].mxu0  ;;  %v1173_v50 = vpop.f32.mrb[6].mxu1  ;;  %v507_v57 = vadd.f32 %v1665_v25, %v506_v47  ;;  %v571_v58 = vadd.f32 %v1665_v25, %v570_v48 }
 0x159   : > { %v518_v53 = vadd.f32 %v1157_v49, %v1665_v25  ;;  %v582_v54 = vadd.f32 %v1173_v50, %v1665_v25  ;;  %v509_v55 = vpop.f32.mrb[7].mxu0  ;;  %v573_v56 = vpop.f32.mrb[7].mxu1 }
 0x15a   : > { %v510_v59 = vadd.f32 %v1665_v25, %v509_v55  ;;  %v574_v60 = vadd.f32 %v1665_v25, %v573_v56 }
 0x15b   : > { %v1033_v61 = vpack.c.bf16 %v518_v53, %v515_v51  ;;  %v1073_v62 = vpack.c.bf16 %v582_v54, %v579_v52 }
 0x15c   : > { %v1028_v63 = vpack.c.bf16 %v510_v59, %v507_v57  ;;  %v1068_v0 = vpack.c.bf16 %v574_v60, %v571_v58 }
 0x15d   : > { %1097 = vst [vmem:[%s1677_s24 + $0x18] sm:$0xff] %v1033_v61   ;;  %1105 = vst [vmem:[%s1677_s24 + $0x58] sm:$0xff] %v1073_v62  }
 0x15e   : > { %1096 = vst [vmem:[%s1677_s24 + $0x10] sm:$0xff] %v1028_v63   ;;  %1104 = vst [vmem:[%s1677_s24 + $0x50] sm:$0xff] %v1068_v0   ;;  %v1160_v1 = vpop.f32.mrb[8].mxu0  ;;  %v1176_v2 = vpop.f32.mrb[8].mxu1 }
 0x15f   : > { %v522_v3 = vpop.f32.mrb[9].mxu0  ;;  %v586_v4 = vpop.f32.mrb[9].mxu1  ;;  %v531_v7 = vadd.f32 %v1160_v1, %v1665_v25  ;;  %v595_v8 = vadd.f32 %v1176_v2, %v1665_v25 }
 0x160   : > { %v1161_v5 = vpop.f32.mrb[10].mxu0  ;;  %v1177_v6 = vpop.f32.mrb[10].mxu1  ;;  %v523_v13 = vadd.f32 %v1665_v25, %v522_v3  ;;  %v587_v14 = vadd.f32 %v1665_v25, %v586_v4 }
 0x161   : > { %v534_v9 = vadd.f32 %v1161_v5, %v1665_v25  ;;  %v598_v10 = vadd.f32 %v1177_v6, %v1665_v25  ;;  %v525_v11 = vpop.f32.mrb[11].mxu0  ;;  %v589_v12 = vpop.f32.mrb[11].mxu1 }
 0x162   : > { %v526_v15 = vadd.f32 %v1665_v25, %v525_v11  ;;  %v590_v16 = vadd.f32 %v1665_v25, %v589_v12 }
 0x163   : > { %v1043_v17 = vpack.c.bf16 %v534_v9, %v531_v7  ;;  %v1083_v18 = vpack.c.bf16 %v598_v10, %v595_v8 }
 0x164   : > { %v1038_v19 = vpack.c.bf16 %v526_v15, %v523_v13  ;;  %v1078_v20 = vpack.c.bf16 %v590_v16, %v587_v14 }
 0x165   : > { %1099 = vst [vmem:[%s1677_s24 + $0x28] sm:$0xff] %v1043_v17   ;;  %1107 = vst [vmem:[%s1677_s24 + $0x68] sm:$0xff] %v1083_v18  }
 0x166   : > { %1098 = vst [vmem:[%s1677_s24 + $0x20] sm:$0xff] %v1038_v19   ;;  %1106 = vst [vmem:[%s1677_s24 + $0x60] sm:$0xff] %v1078_v20   ;;  %v1164_v21 = vpop.f32.mrb[12].mxu0  ;;  %v1180_v22 = vpop.f32.mrb[12].mxu1 }
 0x167   : > { %v538_v23 = vpop.f32.mrb[13].mxu0  ;;  %v602_v24 = vpop.f32.mrb[13].mxu1  ;;  %v547_v28 = vadd.f32 %v1164_v21, %v1665_v25  ;;  %v611_v29 = vadd.f32 %v1180_v22, %v1665_v25 }
 0x168   : > { %v1165_v26 = vpop.f32.mrb[14].mxu0  ;;  %v1181_v27 = vpop.f32.mrb[14].mxu1  ;;  %v539_v34 = vadd.f32 %v1665_v25, %v538_v23  ;;  %v603_v35 = vadd.f32 %v1665_v25, %v602_v24 }
 0x169   : > { %v550_v30 = vadd.f32 %v1165_v26, %v1665_v25  ;;  %v614_v31 = vadd.f32 %v1181_v27, %v1665_v25  ;;  %v541_v32 = vpop.f32.mrb[15].mxu0  ;;  %v605_v33 = vpop.f32.mrb[15].mxu1 }
 0x16a   : > { %v542_v36 = vadd.f32 %v1665_v25, %v541_v32  ;;  %v606_v37 = vadd.f32 %v1665_v25, %v605_v33 }
 0x16b   : > { %v1053_v38 = vpack.c.bf16 %v550_v30, %v547_v28  ;;  %v1093_v39 = vpack.c.bf16 %v614_v31, %v611_v29 }
 0x16c   : > { %v1048_v40 = vpack.c.bf16 %v542_v36, %v539_v34  ;;  %v1088_v41 = vpack.c.bf16 %v606_v37, %v603_v35 }
 0x16d   : > { %1101 = vst [vmem:[%s1677_s24 + $0x38] sm:$0xff] %v1053_v38   ;;  %1109 = vst [vmem:[%s1677_s24 + $0x78] sm:$0xff] %v1093_v39  }
 0x16e   : > { %1100 = vst [vmem:[%s1677_s24 + $0x30] sm:$0xff] %v1048_v40   ;;  %1108 = vst [vmem:[%s1677_s24 + $0x70] sm:$0xff] %v1088_v41  }
 0x16f   : > { %1370 = shalt.err (!%p1367_p5)
}
 0x170   : > { %s1371_s6 = scalar_lea.hbm %s1720_s18, 2048  ;;  %s1375_s19 = scalar_lea.hbm %s1778_s3, 4096 }
 0x171   : > { %p1372_p9 = scmp.ne.s32.totalorder %s1720_s18, %s1371_s6  ;;  %p1376_p3 = scmp.lt.u32.totalorder %s1720_s18, %s1778_s3 }
 0x172   : > { %p1377_p7 = scmp.lt.u32.totalorder %s1375_s19, %s1371_s6  ;;  %p1379_p4 = scmp.lt.u32.totalorder %s1371_s6, %s1720_s18 }
 0x173   : > { %p1373_p1 = pnand %p1372_p9, %p1571_p10 }
 0x174   : > { %p1378_p13 = por %p1377_p7, %p1376_p3 }
 0x175   : > { %p1374_p2 = pneg %p1373_p1 }
 0x176   : > { %p1380_p6 = por %p1379_p4, %p1378_p13 }
 0x178   : > { %p1381_p8 = pnand %p1380_p6, %p1374_p2 }
 0x17a   : > { %1384 = shalt.err (!%p1381_p8)
}
 0x17b   : > { %s1450_s24 = smov 64   ;;  %s1451_s10 = smov 4  }
 0x17c   : > { %1204 = dma.vmem_to_hbm [thread:$0]  (%p1571_p10), %s1722_s11, 2048, %s1720_s18, %s778_s25, %s1450_s24, %s1450_s24, %s1451_s10  }
 0x17d PF: > { %s807_s15 = sand.u32 1, %s1423_s12   ;;  %p1796_p12 = scmp.ne.s32.totalorder %s1786_s23, 0 }
 0x17e   : > { %p1797_p11 = scmp.ge.s32.totalorder %s1443_s17, 2  ;;  %s808_s9 = scalar_lea.sflag [#allocation4], %s807_s15 }
 0x180   : > { %p1215_p0 = pnand %p1797_p11, %p1796_p12 }
 0x182   : > { %1418 = dma.done.wait (!%p1215_p0), %s808_s9, 2048  }
 0x183   : > { %1420 = vsyncadd (!%p1215_p0), %s808_s9, 4294965248  ;;  %s20_s17 = sadd.s32 1, %s1443_s17   ;;  %s1798_s12 = smov %s1427_s13 }
 0x184   : > { %p17_p5 = scmp.ge.s32.totalorder %s20_s17, 4   ;;  %s1799_s13 = smov %s1431_s14 }
 0x185   : > { %s1800_s14 = smov %s1580_s5  ;;  %s1801_s15 = smov %s1439_s16 }
 0x186   : > { %s1802_s16 = smov %s1804_s28  ;;  %19 = sbr.rel (!%p17_p5) target bundleno = 7 (0x7), region = 85 }
 0x18d   :  { %813 = vsyncpa [#allocation3], 1 }
 0x18e   :  { %815 = vsyncpa [#allocation3 + $0x1], 1 }
 0x18f   :  { %816 = vsyncpa [#allocation6], 1 }
 0x190   :  { %817 = vsyncpa [#allocation4], 1 }
 0x191   :  { %819 = vsyncpa [#allocation4 + $0x1], 1 }

</bundles_post_ra>
